<compile_context>
chip_gen: v6e
topology: v6e:2x2x1
jax: 0.10.0
libtpu: 0.0.40
codegen_flags: <defaults>
</compile_context>

<pallas_src>
import jax
import jax.numpy as jnp
from jax import lax
from jax.experimental import pallas as pl
from jax.experimental.pallas import tpu as pltpu


def _r8(n):
    return ((n + 7) // 8) * 8


# ----------------------------- Pallas kernel --------------------------------
def _make_kernel(Ns, Nt, C, h1, h2, lr, o_b2, o_u, o_v):
    NT = Ns + Nt
    f32 = jnp.float32

    def kernel(src_ref, tgt_ref, lbl_ref, w1_ref, b1_ref, pack_ref,
               sp_ref, fs_ref, ft_ref, sims_ref, simt_ref):
        # ---- shared feature extractor on stacked [source; target] ----------
        x = jnp.concatenate([src_ref[...], tgt_ref[...]], axis=0)    # (NT, K)
        h = jnp.dot(x, w1_ref[...], preferred_element_type=f32) + b1_ref[...]
        h = jnp.maximum(h, 0.0)                                      # (NT, h1)

        w2 = pack_ref[0:h1, :]                                       # (h1, h2)
        b2 = pack_ref[o_b2:o_b2 + 1, :]                              # (1, h2)
        u = pack_ref[o_u:o_u + lr, :]                                # (lr, h2)
        v = pack_ref[o_v:o_v + lr, :]                                # (lr, h2)

        f_all = jnp.maximum(
            jnp.dot(h, w2, preferred_element_type=f32) + b2, 0.0)    # (NT, h2)
        fs = f_all[0:Ns, :]                                          # source feats
        ft = f_all[Ns:NT, :]                                         # target feats

        # ---- P = inv(diag(label.sum(0)) + I) @ (label.T @ feature_source) --
        # one-hot labels -> diagonal inverse is elementwise 1/(count_c + 1).
        lbl = lbl_ref[...]                                           # (Ns, C)
        denom = jnp.sum(lbl, axis=0, keepdims=True) + 1.0            # (1, C)
        lbl_scaled = lbl * pl.reciprocal(denom, approx=False)        # exact
        P = lax.dot_general(lbl_scaled, fs, (((0,), (0,)), ((), ())),
                            preferred_element_type=f32)              # (C, h2)

        # stored_mat = V @ P.T
        stored = lax.dot_general(v, P, (((1,), (1,)), ((), ())),
                                 preferred_element_type=f32)         # (lr, C)

        # ---- reassociated bilinear head: pred = f @ (U.T @ stored) ---------
        m_head = lax.dot_general(u, stored, (((0,), (0,)), ((), ())),
                                 preferred_element_type=f32)         # (h2, C)
        pred = jnp.dot(f_all, m_head, preferred_element_type=f32)    # (NT, C)

        # ---- softmax rows + row-normalised cosine similarity ----------------
        mx = jnp.max(pred, axis=1, keepdims=True)
        e = jnp.exp(pred - mx)
        # approx reciprocal is safe ONLY because sm is consumed solely by the
        # cosine normalisation (per-row scale cancels exactly) and pred is
        # returned pre-softmax.
        sm = e * pl.reciprocal(jnp.sum(e, axis=1, keepdims=True), approx=True)
        fn = sm * lax.rsqrt(jnp.sum(sm * sm, axis=1, keepdims=True))
        fn_s = fn[0:Ns, :]
        fn_t = fn[Ns:NT, :]
        sim_s = lax.dot_general(fn_s, fn_s, (((1,), (1,)), ((), ())),
                                preferred_element_type=f32)          # (Ns, Ns)
        sim_t = lax.dot_general(fn_t, fn_t, (((1,), (1,)), ((), ())),
                                preferred_element_type=f32)          # (Nt, Nt)

        # ---- outputs: one full-tile store per ref (no zero-init / RMW) ------
        sp_ref[...] = pred[0:Ns, :]
        fs_ref[...] = fs
        ft_ref[...] = ft
        sims_ref[...] = sim_s
        simt_ref[...] = sim_t

    return kernel


# -------------------- init-time parameter packing (once) ---------------------
def prepare_params(params):
    """Param-only packing, done ONCE at model-init time (not per forward)."""
    f32 = jnp.float32
    h1 = params["w1"].shape[1]
    h2 = params["w2"].shape[1]
    lr = params["U"].shape[0]
    assert params["V"].shape[1] == h2, "model algebra requires hidden_4 == hidden_2"

    def pad_rows(a, rows):
        a = a.astype(f32)
        return jnp.pad(a, ((0, rows - a.shape[0]), (0, 0)))

    o_b2 = _r8(h1)
    o_u = o_b2 + 8
    o_v = o_u + _r8(lr)
    pack = jnp.concatenate(
        [pad_rows(params["w2"], _r8(h1)),
         pad_rows(params["b2"].reshape(1, h2), 8),
         pad_rows(params["U"], _r8(lr)),
         pad_rows(params["V"], _r8(lr))],
        axis=0)                                                      # (rows, h2)

    return {
        "w1": params["w1"].astype(f32),                              # (310, h1)
        "b1": params["b1"].reshape(1, h1).astype(f32),               # (1, h1)
        "pack": pack,
        "dims": (h1, h2, lr, o_b2, o_u, o_v),
    }


# ------------------------------ forward wrapper -------------------------------
def domain_adaption_forward(source, target, source_label, prepared):
    Ns, in_dim = source.shape
    Nt = target.shape[0]
    NT = Ns + Nt
    C = source_label.shape[1]
    h1, h2, lr, o_b2, o_u, o_v = prepared["dims"]
    f32 = jnp.float32

    kernel = _make_kernel(Ns, Nt, C, h1, h2, lr, o_b2, o_u, o_v)

    flops = 2 * (NT * in_dim * h1 + NT * h1 * h2 + Ns * C * h2
                 + lr * h2 * C + h2 * lr * C + NT * h2 * C
                 + Ns * C * Ns + Nt * C * Nt)
    bytes_accessed = 4 * (source.size + target.size + source_label.size
                          + prepared["w1"].size + prepared["b1"].size
                          + prepared["pack"].size
                          + Ns * C + NT * h2 + Ns * Ns + Nt * Nt)
    cost = pl.CostEstimate(flops=flops, transcendentals=NT * (C + 2),
                           bytes_accessed=bytes_accessed)

    vmem = pl.BlockSpec(memory_space=pltpu.MemorySpace.VMEM)
    out_shape = (
        jax.ShapeDtypeStruct((Ns, C), f32),    # source_predict
        jax.ShapeDtypeStruct((Ns, h2), f32),   # feature_source_f
        jax.ShapeDtypeStruct((Nt, h2), f32),   # feature_target_f
        jax.ShapeDtypeStruct((Ns, Ns), f32),   # sim_matrix
        jax.ShapeDtypeStruct((Nt, Nt), f32),   # sim_matrix_target
    )
    sp, fs, ft, sim_s, sim_t = pl.pallas_call(
        kernel,
        out_shape=out_shape,
        in_specs=[vmem] * 6,
        out_specs=(vmem, vmem, vmem, vmem, vmem),
        cost_estimate=cost,
    )(source.astype(f32), target.astype(f32), source_label.astype(f32),
      prepared["w1"], prepared["b1"], prepared["pack"])
    return sp, fs, ft, sim_s, sim_t


# ---------------------------- pure-JAX reference ------------------------------
def _reference(source, target, source_label, p):
    def feat(x):
        h = jnp.maximum(x @ p["w1"] + p["b1"], 0.0)
        return jnp.maximum(h @ p["w2"] + p["b2"], 0.0)

    fs = feat(source)
    ft = feat(target)
    C = source_label.shape[1]
    inv = jnp.linalg.inv(jnp.diag(source_label.sum(axis=0)) + jnp.eye(C))
    P = inv @ (source_label.T @ fs)
    stored = p["V"] @ P.T
    sp = (p["U"] @ fs.T).T @ stored
    tp = (p["U"] @ ft.T).T @ stored

    def cos_sim(x):
        x = jax.nn.softmax(x, axis=1)
        x = x / jnp.linalg.norm(x, axis=1, keepdims=True)
        return x @ x.T

    return sp, fs, ft, cos_sim(sp), cos_sim(tp)


# --------------------------------- main ---------------------------------------
if __name__ == "__main__":
    # Module hyperparameters (stored_mat = V @ P.T requires hidden_4 == hidden_2).
    IN_DIM, H1, H2, H3, H4 = 310, 64, 32, 64, 32
    NUM_CLASS, LOW_RANK = 3, 16
    Ns = Nt = 8

    key = jax.random.PRNGKey(0)
    ks = jax.random.split(key, 10)

    params = {
        # fc weights stored as (in, out) == PyTorch weight.T
        "w1": jax.random.normal(ks[0], (IN_DIM, H1), jnp.float32) * 0.05,
        "b1": jax.random.normal(ks[1], (1, H1), jnp.float32) * 0.05,
        "w2": jax.random.normal(ks[2], (H1, H2), jnp.float32) * 0.05,
        "b2": jax.random.normal(ks[3], (1, H2), jnp.float32) * 0.05,
        "U": jax.random.normal(ks[4], (LOW_RANK, H2), jnp.float32),
        "V": jax.random.normal(ks[5], (LOW_RANK, H4), jnp.float32),
    }

    source = jax.random.normal(ks[6], (Ns, IN_DIM), jnp.float32)
    target = jax.random.normal(ks[7], (Nt, IN_DIM), jnp.float32)
    labels_idx = jax.random.randint(ks[8], (Ns,), 0, NUM_CLASS)
    source_label = jax.nn.one_hot(labels_idx, NUM_CLASS, dtype=jnp.float32)

    # Parameter packing happens ONCE here, not inside the per-call forward.
    prepared = prepare_params(params)
    prepared = jax.block_until_ready(prepared)

    outs = domain_adaption_forward(source, target, source_label, prepared)
    outs = jax.block_until_ready(outs)

    refs = _reference(source, target, source_label, params)
    for o, r in zip(outs, refs):
        assert o.shape == r.shape, (o.shape, r.shape)
        err = float(jnp.max(jnp.abs(o - r)))
        assert err < 1e-3, err

    print("KERNEL_OK")
</pallas_src>

<mosaic_0001>
module attributes {stable_mosaic.version = 11 : i64} {
  func.func @kernel(%arg0: memref<8x310xf32, #tpu.memory_space<vmem>>, %arg1: memref<8x310xf32, #tpu.memory_space<vmem>>, %arg2: memref<8x3xf32, #tpu.memory_space<vmem>>, %arg3: memref<310x64xf32, #tpu.memory_space<vmem>>, %arg4: memref<1x64xf32, #tpu.memory_space<vmem>>, %arg5: memref<104x32xf32, #tpu.memory_space<vmem>>, %arg6: memref<8x3xf32, #tpu.memory_space<vmem>>, %arg7: memref<8x32xf32, #tpu.memory_space<vmem>>, %arg8: memref<8x32xf32, #tpu.memory_space<vmem>>, %arg9: memref<8x8xf32, #tpu.memory_space<vmem>>, %arg10: memref<8x8xf32, #tpu.memory_space<vmem>>) attributes {dimension_semantics = [], scalar_prefetch = 0 : i64, scratch_operands = 0 : i64, tpu.core_type = #tpu.core_type<tc>} {
    %c0 = arith.constant 0 : index
    %c0_0 = arith.constant 0 : index
    %0 = vector.load %arg0[%c0, %c0_0] : memref<8x310xf32, #tpu.memory_space<vmem>>, vector<8x310xf32>
    %c0_1 = arith.constant 0 : index
    %c0_2 = arith.constant 0 : index
    %1 = vector.load %arg1[%c0_1, %c0_2] : memref<8x310xf32, #tpu.memory_space<vmem>>, vector<8x310xf32>
    %2 = tpu.concatenate %0, %1 in 0 : vector<8x310xf32>, vector<8x310xf32> -> vector<16x310xf32>
    %c0_3 = arith.constant 0 : index
    %c0_4 = arith.constant 0 : index
    %3 = vector.load %arg3[%c0_3, %c0_4] : memref<310x64xf32, #tpu.memory_space<vmem>>, vector<310x64xf32>
    %cst = arith.constant dense<0.000000e+00> : vector<16x64xf32>
    %4 = tpu.matmul %2, %3, %cst {dimension_numbers = #tpu.dot_dimension_numbers<[1], [0], [0], [1], [0, 0, 1, 1], [], []>} : vector<16x310xf32>, vector<310x64xf32>, vector<16x64xf32> -> vector<16x64xf32>
    %c0_5 = arith.constant 0 : index
    %c0_6 = arith.constant 0 : index
    %5 = vector.load %arg4[%c0_5, %c0_6] : memref<1x64xf32, #tpu.memory_space<vmem>>, vector<1x64xf32>
    %6 = vector.broadcast %5 : vector<1x64xf32> to vector<16x64xf32>
    %7 = arith.addf %4, %6 : vector<16x64xf32>
    %cst_7 = arith.constant 0.000000e+00 : f32
    %8 = vector.broadcast %cst_7 : f32 to vector<16x64xf32>
    %9 = arith.maximumf %7, %8 : vector<16x64xf32>
    %c0_8 = arith.constant 0 : index
    %c0_9 = arith.constant 0 : index
    %10 = vector.load %arg5[%c0_8, %c0_9] : memref<104x32xf32, #tpu.memory_space<vmem>>, vector<64x32xf32>
    %c64 = arith.constant 64 : index
    %c0_10 = arith.constant 0 : index
    %11 = vector.load %arg5[%c64, %c0_10] : memref<104x32xf32, #tpu.memory_space<vmem>>, vector<1x32xf32>
    %c72 = arith.constant 72 : index
    %c0_11 = arith.constant 0 : index
    %12 = vector.load %arg5[%c72, %c0_11] : memref<104x32xf32, #tpu.memory_space<vmem>>, vector<16x32xf32>
    %c88 = arith.constant 88 : index
    %c0_12 = arith.constant 0 : index
    %13 = vector.load %arg5[%c88, %c0_12] : memref<104x32xf32, #tpu.memory_space<vmem>>, vector<16x32xf32>
    %cst_13 = arith.constant dense<0.000000e+00> : vector<16x32xf32>
    %14 = tpu.matmul %9, %10, %cst_13 {dimension_numbers = #tpu.dot_dimension_numbers<[1], [0], [0], [1], [0, 0, 1, 1], [], []>} : vector<16x64xf32>, vector<64x32xf32>, vector<16x32xf32> -> vector<16x32xf32>
    %15 = vector.broadcast %11 : vector<1x32xf32> to vector<16x32xf32>
    %16 = arith.addf %14, %15 : vector<16x32xf32>
    %cst_14 = arith.constant 0.000000e+00 : f32
    %17 = vector.broadcast %cst_14 : f32 to vector<16x32xf32>
    %18 = arith.maximumf %16, %17 : vector<16x32xf32>
    %19 = vector.extract_strided_slice %18 {offsets = [0, 0], sizes = [8, 32], strides = [1, 1]} : vector<16x32xf32> to vector<8x32xf32>
    %20 = vector.extract_strided_slice %18 {offsets = [8, 0], sizes = [8, 32], strides = [1, 1]} : vector<16x32xf32> to vector<8x32xf32>
    %c0_15 = arith.constant 0 : index
    %c0_16 = arith.constant 0 : index
    %21 = vector.load %arg2[%c0_15, %c0_16] : memref<8x3xf32, #tpu.memory_space<vmem>>, vector<8x3xf32>
    %cst_17 = arith.constant dense<0.000000e+00> : vector<3xf32>
    %22 = vector.multi_reduction <add>, %21, %cst_17 [0] : vector<8x3xf32> to vector<3xf32>
    %23 = vector.shape_cast %22 : vector<3xf32> to vector<1x3xf32>
    %cst_18 = arith.constant 1.000000e+00 : f32
    %24 = vector.broadcast %cst_18 : f32 to vector<1x3xf32>
    %25 = arith.addf %23, %24 : vector<1x3xf32>
    %26 = tpu.reciprocal %25 : vector<1x3xf32> -> vector<1x3xf32>
    %27 = vector.broadcast %26 : vector<1x3xf32> to vector<8x3xf32>
    %28 = arith.mulf %21, %27 : vector<8x3xf32>
    %cst_19 = arith.constant dense<0.000000e+00> : vector<3x32xf32>
    %29 = tpu.matmul %28, %19, %cst_19 {dimension_numbers = #tpu.dot_dimension_numbers<[0], [0], [1], [1], [0, 1, 1, 1], [], []>} : vector<8x3xf32>, vector<8x32xf32>, vector<3x32xf32> -> vector<3x32xf32>
    %cst_20 = arith.constant dense<0.000000e+00> : vector<16x3xf32>
    %30 = tpu.matmul %13, %29, %cst_20 {dimension_numbers = #tpu.dot_dimension_numbers<[1], [1], [0], [0], [0, 0, 1, 0], [], []>} : vector<16x32xf32>, vector<3x32xf32>, vector<16x3xf32> -> vector<16x3xf32>
    %cst_21 = arith.constant dense<0.000000e+00> : vector<32x3xf32>
    %31 = tpu.matmul %12, %30, %cst_21 {dimension_numbers = #tpu.dot_dimension_numbers<[0], [0], [1], [1], [0, 1, 1, 1], [], []>} : vector<16x32xf32>, vector<16x3xf32>, vector<32x3xf32> -> vector<32x3xf32>
    %cst_22 = arith.constant dense<0.000000e+00> : vector<16x3xf32>
    %32 = tpu.matmul %18, %31, %cst_22 {dimension_numbers = #tpu.dot_dimension_numbers<[1], [0], [0], [1], [0, 0, 1, 1], [], []>} : vector<16x32xf32>, vector<32x3xf32>, vector<16x3xf32> -> vector<16x3xf32>
    %cst_23 = arith.constant dense<0xFF800000> : vector<16xf32>
    %33 = vector.multi_reduction <maximumf>, %32, %cst_23 [1] : vector<16x3xf32> to vector<16xf32>
    %34 = vector.shape_cast %33 : vector<16xf32> to vector<16x1xf32>
    %35 = vector.broadcast %34 : vector<16x1xf32> to vector<16x3xf32>
    %36 = arith.subf %32, %35 : vector<16x3xf32>
    %37 = math.exp %36 : vector<16x3xf32>
    %cst_24 = arith.constant dense<0.000000e+00> : vector<16xf32>
    %38 = vector.multi_reduction <add>, %37, %cst_24 [1] : vector<16x3xf32> to vector<16xf32>
    %39 = vector.shape_cast %38 : vector<16xf32> to vector<16x1xf32>
    %40 = tpu.reciprocal %39 {approx = true} : vector<16x1xf32> -> vector<16x1xf32>
    %41 = vector.broadcast %40 : vector<16x1xf32> to vector<16x3xf32>
    %42 = arith.mulf %37, %41 : vector<16x3xf32>
    %43 = arith.mulf %42, %42 : vector<16x3xf32>
    %cst_25 = arith.constant dense<0.000000e+00> : vector<16xf32>
    %44 = vector.multi_reduction <add>, %43, %cst_25 [1] : vector<16x3xf32> to vector<16xf32>
    %45 = vector.shape_cast %44 : vector<16xf32> to vector<16x1xf32>
    %46 = math.rsqrt %45 : vector<16x1xf32>
    %47 = vector.broadcast %46 : vector<16x1xf32> to vector<16x3xf32>
    %48 = arith.mulf %42, %47 : vector<16x3xf32>
    %49 = vector.extract_strided_slice %48 {offsets = [0, 0], sizes = [8, 3], strides = [1, 1]} : vector<16x3xf32> to vector<8x3xf32>
    %50 = vector.extract_strided_slice %48 {offsets = [8, 0], sizes = [8, 3], strides = [1, 1]} : vector<16x3xf32> to vector<8x3xf32>
    %cst_26 = arith.constant dense<0.000000e+00> : vector<8x8xf32>
    %51 = tpu.matmul %49, %49, %cst_26 {dimension_numbers = #tpu.dot_dimension_numbers<[1], [1], [0], [0], [0, 0, 1, 0], [], []>} : vector<8x3xf32>, vector<8x3xf32>, vector<8x8xf32> -> vector<8x8xf32>
    %cst_27 = arith.constant dense<0.000000e+00> : vector<8x8xf32>
    %52 = tpu.matmul %50, %50, %cst_27 {dimension_numbers = #tpu.dot_dimension_numbers<[1], [1], [0], [0], [0, 0, 1, 0], [], []>} : vector<8x3xf32>, vector<8x3xf32>, vector<8x8xf32> -> vector<8x8xf32>
    %53 = vector.extract_strided_slice %32 {offsets = [0, 0], sizes = [8, 3], strides = [1, 1]} : vector<16x3xf32> to vector<8x3xf32>
    %c0_28 = arith.constant 0 : index
    %c0_29 = arith.constant 0 : index
    %54 = vector.load %arg6[%c0_28, %c0_29] : memref<8x3xf32, #tpu.memory_space<vmem>>, vector<8x3xf32>
    tpu.vector_store %arg6[%c0_28, %c0_29], %53 {strides = array<i32>} : memref<8x3xf32, #tpu.memory_space<vmem>>, vector<8x3xf32>,
    %c0_30 = arith.constant 0 : index
    %c0_31 = arith.constant 0 : index
    %55 = vector.load %arg7[%c0_30, %c0_31] : memref<8x32xf32, #tpu.memory_space<vmem>>, vector<8x32xf32>
    tpu.vector_store %arg7[%c0_30, %c0_31], %19 {strides = array<i32>} : memref<8x32xf32, #tpu.memory_space<vmem>>, vector<8x32xf32>,
    %c0_32 = arith.constant 0 : index
    %c0_33 = arith.constant 0 : index
    %56 = vector.load %arg8[%c0_32, %c0_33] : memref<8x32xf32, #tpu.memory_space<vmem>>, vector<8x32xf32>
    tpu.vector_store %arg8[%c0_32, %c0_33], %20 {strides = array<i32>} : memref<8x32xf32, #tpu.memory_space<vmem>>, vector<8x32xf32>,
    %c0_34 = arith.constant 0 : index
    %c0_35 = arith.constant 0 : index
    %57 = vector.load %arg9[%c0_34, %c0_35] : memref<8x8xf32, #tpu.memory_space<vmem>>, vector<8x8xf32>
    tpu.vector_store %arg9[%c0_34, %c0_35], %51 {strides = array<i32>} : memref<8x8xf32, #tpu.memory_space<vmem>>, vector<8x8xf32>,
    %c0_36 = arith.constant 0 : index
    %c0_37 = arith.constant 0 : index
    %58 = vector.load %arg10[%c0_36, %c0_37] : memref<8x8xf32, #tpu.memory_space<vmem>>, vector<8x8xf32>
    tpu.vector_store %arg10[%c0_36, %c0_37], %52 {strides = array<i32>} : memref<8x8xf32, #tpu.memory_space<vmem>>, vector<8x8xf32>,
    return
  }
}

</mosaic_0001>

<bundles_post_ra>
// kernel: tpu_custom_call.1
= control target key start
LH: loop header
LB: loop body
LE: loop exit
PB: predicated region body
PF: predicated region fallthrough
CT: control target
= control target key end

     0   :  { %16 = vsyncpa [#allocation3], 0  ;;  %s1569_s0 = inlined_call_operand.vmem [shape: f32[8,310], index: 0, kind: input, shape index: {}]   ;;  %s1570_s1 = inlined_call_operand.vmem [shape: f32[8,310], index: 1, kind: input, shape index: {}]   ;;  %s1571_s2 = inlined_call_operand.vmem [shape: f32[8,3], index: 2, kind: input, shape index: {}]   ;;  %s1572_s3 = inlined_call_operand.vmem [shape: f32[310,64], index: 3, kind: input, shape index: {}]   ;;  %s1573_s4 = inlined_call_operand.vmem [shape: f32[1,64], index: 4, kind: input, shape index: {}]   ;;  %s1574_s5 = inlined_call_operand.vmem [shape: f32[104,32], index: 5, kind: input, shape index: {}]   ;;  %s1575_s6 = inlined_call_operand.vmem [shape: f32[8,3], index: 6, kind: output, shape index: {0}]   ;;  %s1576_s7 = inlined_call_operand.hbm [shape: f32[8,32], index: 7, kind: output, shape index: {1}]   ;;  %s1577_s8 = inlined_call_operand.hbm [shape: f32[8,32], index: 8, kind: output, shape index: {2}]   ;;  %s1578_s9 = inlined_call_operand.hbm [shape: f32[8,8], index: 9, kind: output, shape index: {3}]   ;;  %s1579_s10 = inlined_call_operand.hbm [shape: f32[8,8], index: 10, kind: output, shape index: {4}]  }
   0x1   :  { %17 = vsyncpa [#allocation5], 0  ;;  %v68_v0 = vld [vmem:[%s1572_s3 + $0xf8] sm:$0xff]  ;;  %v67_v2 = vld [vmem:[%s1572_s3 + $0xf0] sm:$0xff]  ;;  %vm90_vm0 = vcmask 1045504  }
   0x2   :  { %v52_v1 = vld [vmem:[%s1572_s3 + $0x78] sm:$0xff]  ;;  %1026 = vmatprep.subr.mxu0 %v68_v0  ;;  %v51_v3 = vld [vmem:[%s1572_s3 + $0x70] sm:$0xff]  ;;  %v66_v4 = vld [vmem:[%s1572_s3 + $0xe8] sm:$0xff] }
   0x3   :  { %1027 = vmatpush3.msra.mxu0 %v52_v1  ;;  %v50_v5 = vld [vmem:[%s1572_s3 + $0x68] sm:$0xff]  ;;  %v65_v6 = vld [vmem:[%s1572_s3 + $0xe0] sm:$0xff]  ;;  %v64_v8 = vld [vmem:[%s1572_s3 + $0xd8] sm:$0xff] }
   0x4   :  { %1028 = vmatprep.subr.mxu0 %v67_v2  ;;  %v49_v7 = vld [vmem:[%s1572_s3 + $0x60] sm:$0xff]  ;;  %v48_v9 = vld [vmem:[%s1572_s3 + $0x58] sm:$0xff]  ;;  %v75_v10 = vld [vmem:[%s1572_s3 + $0x130] sm:$0x3f] }
   0x5   :  { %1029 = vmatpush3.msra.mxu0 %v51_v3  ;;  %v63_v11 = vld [vmem:[%s1572_s3 + $0xd0] sm:$0xff]  ;;  %1104 = vmatprep.subr.msk.mxu1 %vm90_vm0, %v75_v10  ;;  %v74_v12 = vld [vmem:[%s1572_s3 + $0x128] sm:$0xff]  ;;  %v73_v14 = vld [vmem:[%s1572_s3 + $0x120] sm:$0xff] }
   0x6   :  { %1030 = vmatprep.subr.mxu0 %v66_v4  ;;  %v47_v13 = vld [vmem:[%s1572_s3 + $0x50] sm:$0xff]  ;;  %1105 = vmatpush3.msk.msra.mxu1 %vm90_vm0, %v75_v10  ;;  %v62_v15 = vld [vmem:[%s1572_s3 + $0xc8] sm:$0xff]  ;;  %v72_v17 = vld [vmem:[%s1572_s3 + $0x118] sm:$0xff] }
   0x7   :  { %1031 = vmatpush3.msra.mxu0 %v50_v5  ;;  %1106 = vmatprep.subr.mxu1 %v74_v12  ;;  %v46_v16 = vld [vmem:[%s1572_s3 + $0x48] sm:$0xff]  ;;  %v61_v18 = vld [vmem:[%s1572_s3 + $0xc0] sm:$0xff]  ;;  %v71_v20 = vld [vmem:[%s1572_s3 + $0x110] sm:$0xff] }
   0x8   :  { %1032 = vmatprep.subr.mxu0 %v65_v6  ;;  %1107 = vmatpush3.msra.mxu1 %v74_v12  ;;  %v45_v19 = vld [vmem:[%s1572_s3 + $0x40] sm:$0xff]  ;;  %v60_v21 = vld [vmem:[%s1572_s3 + $0xb8] sm:$0xff]  ;;  %v32_v22 = vld [vmem:[%s1569_s0 + $0x8] sm:$0xff] }
   0x9   :  { %1033 = vmatpush3.msra.mxu0 %v49_v7  ;;  %1108 = vmatprep.subr.mxu1 %v73_v14  ;;  %v44_v23 = vld [vmem:[%s1572_s3 + $0x38] sm:$0xff] }
   0xa   :  { %1034 = vmatprep.subr.mxu0 %v64_v8  ;;  %1109 = vmatpush3.msra.mxu1 %v73_v14 }
   0xb   :  { %1035 = vmatpush3.msra.mxu0 %v48_v9  ;;  %1110 = vmatprep.subr.mxu1 %v72_v17 }
   0xc   :  { %1036 = vmatprep.subr.mxu0 %v63_v11  ;;  %1111 = vmatpush3.msra.mxu1 %v72_v17 }
   0xd   :  { %1037 = vmatpush3.msra.mxu0 %v47_v13 }
   0xe   :  { %1038 = vmatprep.subr.mxu0 %v62_v15 }
   0xf   :  { %1039 = vmatpush3.msra.mxu0 %v46_v16 }
  0x10   :  { %1040 = vmatprep.subr.mxu0 %v61_v18 }
  0x11   :  { %18 = vsyncpa [#allocation8], 0  ;;  %1041 = vmatpush3.msra.mxu0 %v45_v19  ;;  %v59_v24 = vld [vmem:[%s1572_s3 + $0xb0] sm:$0xff]  ;;  %1112 = vmatprep.subr.mxu1 %v71_v20  ;;  %v70_v25 = vld [vmem:[%s1572_s3 + $0x108] sm:$0xff]  ;;  %vm83_vm1 = vcmask 441344   ;;  %vm348_vm2 = vcmask 23552  }
  0x12   :  { %1042 = vmatprep.subr.mxu0 %v60_v21  ;;  %v43_v26 = vld [vmem:[%s1572_s3 + $0x30] sm:$0xff]  ;;  %158 = vmatprep.mubr.f32.mxu0 %v32_v22  ;;  %v58_v27 = vld [vmem:[%s1572_s3 + $0xa8] sm:$0xff]  ;;  %v69_v28 = vld [vmem:[%s1572_s3 + $0x100] sm:$0xff]  ;;  %vm263_vm3 = vcmask 523264   ;;  %v1287_v15 = vmov 0.0   ;;  %vm1288_vm4 = vmmov 0  }
  0x13   :  { %1043 = vmatpush3.msra.mxu0 %v44_v23  ;;  %1113 = vmatpush3.msra.mxu1 %v71_v20  ;;  %v42_v29 = vld [vmem:[%s1572_s3 + $0x28] sm:$0xff]  ;;  %v57_v30 = vld [vmem:[%s1572_s3 + $0xa0] sm:$0xff]  ;;  %v33_v31 = vld [vmem:[%s1569_s0 + $0x10] sm:$0xff]  ;;  %vm465_vm5 = vcmask 261120   ;;  %vm391_vm6 = vcmask 64512   ;;  %vm582_vm7 = vcmask 130048  }
  0x14   :  { %1044 = vmatprep.subr.mxu0 %v59_v24  ;;  %1114 = vmatprep.subr.mxu1 %v70_v25  ;;  %v41_v32 = vld [vmem:[%s1572_s3 + $0x20] sm:$0xff]  ;;  %v36_v33 = vld [vmem:[%s1570_s1 + $0x10] sm:$0xff]  ;;  %v56_v34 = vld [vmem:[%s1572_s3 + $0x98] sm:$0xff]  ;;  %s1290_s28 = smov [#allocation2]  }
  0x15   :  { %1045 = vmatpush3.msra.mxu0 %v43_v26  ;;  %1115 = vmatpush3.msra.mxu1 %v70_v25  ;;  %v253_v35 = vld [vmem:[%s1574_s5 + $0x38] sm:$0xff]  ;;  %v55_v37 = vld [vmem:[%s1572_s3 + $0x90] sm:$0xff]  ;;  %v54_v39 = vld [vmem:[%s1572_s3 + $0x88] sm:$0xff] }
  0x16   :  { %1046 = vmatprep.subr.mxu0 %v58_v27  ;;  %1116 = vmatprep.subr.mxu1 %v69_v28  ;;  %v40_v36 = vld [vmem:[%s1572_s3 + $0x18] sm:$0xff]  ;;  %v39_v38 = vld [vmem:[%s1572_s3 + $0x10] sm:$0xff]  ;;  %v38_v40 = vld [vmem:[%s1572_s3 + $0x8] sm:$0xff] }
  0x17   :  { %1047 = vmatpush3.msra.mxu0 %v42_v29  ;;  %1117 = vmatpush3.msra.mxu1 %v69_v28  ;;  %v53_v41 = vld [vmem:[%s1572_s3 + $0x80] sm:$0xff]  ;;  %v35_v44 = vld [vmem:[%s1570_s1 + $0x8] sm:$0xff]  ;;  %v252_v46 = vld [vmem:[%s1574_s5 + $0x30] sm:$0xff] }
  0x18   :  { %1048 = vmatprep.subr.mxu0 %v57_v30  ;;  %1118 = vmatprep.mubr.msk.f32.mxu1 %vm83_vm1, %v33_v31  ;;  %v37_v42 = vld [vmem:[%s1572_s3] sm:$0xff]  ;;  %v251_v47 = vld [vmem:[%s1574_s5 + $0x28] sm:$0xff]  ;;  %v249_v49 = vld [vmem:[%s1574_s5 + $0x18] sm:$0xff] }
  0x19   :  { %1049 = vmatpush3.msra.mxu0 %v41_v32  ;;  %1119 = vmatmul.mubr.msk.f32.vlgmr.msra.gmra.mxu1 %vm83_vm1, %v36_v33  ;;  %v31_v43 = vld [vmem:[%s1569_s0] sm:$0xff]  ;;  %v248_v50 = vld [vmem:[%s1574_s5 + $0x10] sm:$0xff]  ;;  %v247_v51 = vld [vmem:[%s1574_s5 + $0x8] sm:$0xff] }
  0x1a   :  { %1050 = vmatprep.subr.mxu0 %v56_v34  ;;  %1121 = vmatprep.subr.mxu1 %v253_v35  ;;  %v34_v45 = vld [vmem:[%s1570_s1] sm:$0xff]  ;;  %v257_v24 = vld [vmem:[%s1574_s5 + $0x58] sm:$0xff]  ;;  %v255_v25 = vld [vmem:[%s1574_s5 + $0x48] sm:$0xff]  ;;  %s954_s1 = sshll.u32 %s1290_s28, 4  ;;  %s955_s1 = int_to_ptr.vmem [resolvable:$true] %s954_s1 }
  0x1b   :  { %1051 = vmatpush3.msra.mxu0 %v40_v36  ;;  %1122 = vmatpush3.msra.mxu1 %v253_v35  ;;  %v250_v48 = vld [vmem:[%s1574_s5 + $0x20] sm:$0xff]  ;;  %v256_v26 = vld [vmem:[%s1574_s5 + $0x50] sm:$0xff] }
  0x1c   :  { %1052 = vmatprep.subr.mxu0 %v55_v37  ;;  %1123 = vmatprep.subr.mxu1 %v252_v46  ;;  %v246_v52 = vld [vmem:[%s1574_s5] sm:$0xff] }
  0x1d   :  { %1053 = vmatpush3.msra.mxu0 %v39_v38  ;;  %1124 = vmatpush3.msra.mxu1 %v252_v46  ;;  %v347_v53 = vld [vmem:[%s1571_s2] sm:$0xff] }
  0x1e   :  { %1054 = vmatprep.subr.mxu0 %v54_v39  ;;  %1125 = vmatprep.subr.mxu1 %v251_v47  ;;  %v349_v54 = vsel %vm348_vm2, %v347_v53, 0.0  ;;  %v1005_v3 = vld [vmem:[%s1573_s4] ss:$0 sm:$0xff] }
  0x1f   :  { %1055 = vmatpush3.msra.mxu0 %v38_v40  ;;  %1126 = vmatpush3.msra.mxu1 %v251_v47  ;;  %v350_v55 = vrot.slane %v349_v54, 4  ;;  %v1009_v16 = vld [vmem:[%s1574_s5 + $0x40] ss:$0 sm:$0xff] }
  0x20   :  { %1056 = vmatprep.subr.mxu0 %v53_v41  ;;  %1127 = vmatprep.subr.mxu1 %v250_v48  ;;  %v258_v29 = vld [vmem:[%s1574_s5 + $0x60] sm:$0xff] }
  0x21   :  { %1057 = vmatpush3.msra.mxu0 %v37_v42  ;;  %1128 = vmatpush3.msra.mxu1 %v250_v48  ;;  %v351_v56 = vadd.f32 %v350_v55, %v349_v54 }
  0x22   :  { %159 = vmatmul.mubr.f32.vlgmr.msra.gmra.mxu0 %v31_v43  ;;  %1129 = vmatprep.subr.mxu1 %v249_v49 }
  0x23   :  { %163 = vmatprep.mubr.f32.mxu0 %v35_v44  ;;  %1130 = vmatpush3.msra.mxu1 %v249_v49  ;;  %v352_v57 = vrot.slane %v351_v56, 2 }
  0x24   :  { %1131 = vmatprep.subr.mxu1 %v248_v50 }
  0x25   :  { %1132 = vmatpush3.msra.mxu1 %v248_v50  ;;  %v353_v58 = vadd.f32 %v352_v57, %v351_v56 }
  0x26   :  { %164 = vmatmul.mubr.f32.gmra.mxu0 %v34_v45  ;;  %1133 = vmatprep.subr.mxu1 %v247_v51 }
  0x27   :  { %1134 = vmatpush3.msra.mxu1 %v247_v51  ;;  %v354_v59 = vrot.slane %v353_v58, 1 }
  0x28   :  { %1135 = vmatprep.subr.mxu1 %v246_v52 }
  0x29   :  { %1136 = vmatpush3.msra.mxu1 %v246_v52  ;;  %v355_v60 = vadd.f32 %v354_v59, %v353_v58 }
  0x2a   :  { %1140 = vmatprep.subr.mxu1 %v1287_v15 }
  0x2b   :  { %v356_v61 = vadd.f32 1.0, %v355_v60 }
  0x2d   :  { %1187 = vrcp.f32 %v356_v61 }
  0x3a   :  { %v1188_v62 = vpop.eup %1187 }
  0x3b   :  { %v358_v63 = vmul.f32 %v1188_v62, %v347_v53 }
  0x3d   :  { %359 = vxpose.xlu0.b32.start.end [1/1] (short) (narrow) %v358_v63, 8 }
  0x41   :  { %550 = vxpose.xlu0.b32.start [1/2] (short) (narrow) %v255_v25, 32 }
  0x45   :  { %551 = vxpose.xlu0.b32.end [2/2] (short) (narrow) %v256_v26, 32 }
  0xb9   :  { %v375_v23 = vpop.trf.xlu0 }
  0xbd   :  { %v566_v30 = vpop.trf.xlu0 }
  0xbe   :  { %1154 = vmatprep.mubr.msk.f32.mxu0 %vm582_vm7, %v566_v30 }
  0xc1   :  { %v567_v31 = vpop.trf.xlu0 }
  0xc5   :  { %v568_v33 = vpop.trf.xlu0 }
  0xc9   :  { %v569_v35 = vpop.trf.xlu0 }
  0xd9   :  { %v1120_v1 = vpop.f32.mrf.mxu1 }
  0xdb   :  { %v235_v6 = vpop.f32.mrf.mxu1 }
  0xe2   :  { %v1058_v0 = vpop.f32.mrf.mxu0 }
  0xe4   :  { %v1059_v2 = vpop.f32.mrf.mxu0 }
  0xe5   :  { %v1060_v4 = vadd.f32 %v1059_v2, %v1058_v0 }
  0xe6   :  { %v1061_v5 = vpop.f32.mrf.mxu0 }
  0xe7   :  { %v161_v7 = vadd.f32 %v1060_v4, %v1005_v3 }
  0xe8   :  { %v1062_v8 = vpop.f32.mrf.mxu0 }
  0xe9   :  { %v1063_v9 = vadd.f32 %v1062_v8, %v1061_v5  ;;  %v236_v10 = vadd.f32 %v235_v6, %v161_v7 }
  0xeb   :  { %v166_v11 = vadd.f32 %v1063_v9, %v1005_v3  ;;  %v244_v12 = vmax.f32 %v236_v10, 0.0 }
  0xed   :  { %v241_v13 = vadd.f32 %v1120_v1, %v166_v11  ;;  %1137 = vmatprep.mubr.msk.f32.mxu1 %vm263_vm3, %v244_v12 }
  0xef   :  { %v245_v14 = vmax.f32 %v241_v13, 0.0 }
  0xf1   :  { %1138 = vmatmul.mubr.msk.f32.vlgmr.msra.gmra.mxu1 %vm263_vm3, %v245_v14 }
  0xf2   :  { %1142 = vmatprep.mubr.msk.f32.mxu1 %vm1288_vm4, %v1287_v15 }
 0x1b1   :  { %v1139_v17 = vpop.f32.mrf.mxu1 }
 0x1b2   :  { %v342_v18 = vadd.f32 %v1139_v17, %v1009_v16 }
 0x1b3   :  { %v336_v19 = vpop.f32.mrf.mxu1 }
 0x1b4   :  { %v346_v20 = vmax.f32 %v342_v18, 0.0  ;;  %v337_v21 = vadd.f32 %v1009_v16, %v336_v19 }
 0x1b6   :  { %v345_v22 = vmax.f32 %v337_v21, 0.0  ;;  %943 = vst.msk [vmem:[#allocation4] sm:$0xff] %vm465_vm5, %v346_v20 }
 0x1b8   :  { %1141 = vmatpush3.msra.mxu1 %v345_v22  ;;  %942 = vst.msk [vmem:[#allocation2] sm:$0xff] %vm465_vm5, %v345_v22 }
 0x1b9   :  { %1143 = vmatmul.mubr.msk.f32.vlgmr.msra.gmra.mxu1 %vm391_vm6, %v375_v23 }
 0x1ba   :  { %1147 = vmatprep.mubr.msk.f32.mxu1 %vm465_vm5, %v257_v24 }
 0x279   :  { %v461_v27 = vpop.f32.mrf.mxu1 }
 0x27a   :  { %1145 = vmatprep.subr.msk.mxu1 %vm465_vm5, %v461_v27 }
 0x27b   :  { %v1144_v28 = vpop.f32.mrf.mxu1  ;;  %1146 = vmatpush3.xpose.msk.msra.mxu1 %vm465_vm5, %v461_v27 }
 0x27e   :  { %1148 = vmatmul.mubr.msk.f32.vlgmr.msra.gmra.mxu1 %vm465_vm5, %v258_v29 }
 0x27f   :  { %1168 = vmatprep.mubr.msk.f32.mxu1 %vm465_vm5, %v345_v22 }
 0x33e   :  { %v1149_v32 = vpop.f32.mrf.mxu1 }
 0x33f   :  { %1150 = vmatprep.subr.mxu0 %v1149_v32 }
 0x340   :  { %v541_v34 = vpop.f32.mrf.mxu1  ;;  %1151 = vmatpush3.msra.mxu0 %v1149_v32 }
 0x341   :  { %1152 = vmatprep.subr.mxu0 %v541_v34 }
 0x342   :  { %1153 = vmatpush3.msra.mxu0 %v541_v34 }
 0x343   :  { %1155 = vmatmul.mubr.msk.f32.vlgmr.msra.gmra.mxu0 %vm582_vm7, %v567_v31  ;;  %1171 = vmatprep.subr.mxu0 %v1287_v15 }
 0x344   :  { %1157 = vmatprep.mubr.msk.f32.mxu0 %vm582_vm7, %v568_v33 }
 0x347   :  { %1158 = vmatmul.mubr.msk.f32.gmra.mxu0 %vm582_vm7, %v569_v35 }
 0x348   :  { %1173 = vmatprep.mubr.msk.f32.mxu0 %vm1288_vm4, %v1287_v15 }
 0x403   :  { %v1156_v36 = vpop.f32.mrf.mxu0 }
 0x405   :  { %v661_v37 = vpop.f32.mrf.mxu0 }
 0x407   :  { %v1159_v38 = vpop.f32.mrf.mxu0 }
 0x408   :  { %1160 = vmatprep.subr.mxu1 %v1159_v38 }
 0x409   :  { %v671_v39 = vpop.f32.mrf.mxu0  ;;  %1161 = vmatpush3.msra.mxu1 %v1159_v38 }
 0x40a   :  { %1162 = vmatprep.subr.mxu1 %v671_v39 }
 0x40b   :  { %1163 = vmatpush3.msra.mxu1 %v671_v39 }
 0x40c   :  { %1164 = vmatprep.subr.mxu1 %v1156_v36 }
 0x40d   :  { %1165 = vmatpush3.msra.mxu1 %v1156_v36 }
 0x40e   :  { %1166 = vmatprep.subr.mxu1 %v661_v37 }
 0x40f   :  { %1167 = vmatpush3.msra.mxu1 %v661_v37 }
 0x410   :  { %1169 = vmatmul.mubr.msk.f32.vlgmr.msra.gmra.mxu1 %vm465_vm5, %v346_v20  ;;  %1176 = vmatprep.subr.mxu1 %v1287_v15 }
 0x411   :  { %1178 = vmatprep.mubr.msk.f32.mxu1 %vm1288_vm4, %v1287_v15 }
 0x4d0   :  { %v1170_v40 = vpop.f32.mrf.mxu1 }
 0x4d1   :  { %v764_v43 = vsel %vm348_vm2, %v1170_v40, -inf }
 0x4d2   :  { %v752_v41 = vpop.f32.mrf.mxu1 }
 0x4d3   :  { %941 = vst.msk [vmem:[%s1575_s6] sm:$0xff] %vm348_vm2, %v752_v41  ;;  %v761_v42 = vsel %vm348_vm2, %v752_v41, -inf  ;;  %s1289_s6 = smov [#allocation4]  }
 0x4d4   :  { %762 = vmax.xlane.f32.xlu1 %v761_v42  ;;  %s964_s27 = sshll.u32 %s1289_s6, 4  ;;  %s965_s27 = int_to_ptr.vmem [resolvable:$true] %s964_s27 }
 0x4d5   :  { %s1201_s29 = scalar_lea.vmem %s965_s27, 128  ;;  %p1206_p1 = scmp.lt.s32.totalorder %s965_s27, %s965_s27 }
 0x4d6   :  { %p1202_p0 = scmp.ne.s32.totalorder %s965_s27, %s1201_s29  ;;  %p1207_p2 = scmp.lt.s32.totalorder %s1201_s29, %s1201_s29 }
 0x4d8   :  { %765 = vmax.xlane.f32.xlu1 %v764_v43  ;;  %p1208_p3 = por %p1207_p2, %p1206_p1 }
 0x4da   :  { %p1209_p4 = pnand %p1208_p3, %p1202_p0 }
 0x55d   :  { %v763_v44 = vpop.xlane.xlu1 %762 }
 0x55e   :  { %v767_v45 = vsub.f32 %v752_v41, %v763_v44 }
 0x560   :  { %v769_v46 = vmul.f32 1.442695, %v767_v45 }
 0x561   :  { %v766_v47 = vpop.xlane.xlu1 %765 }
 0x562   :  { %1189 = vpow2.f32 %v769_v46  ;;  %v768_v48 = vsub.f32 %v1170_v40, %v766_v47 }
 0x564   :  { %v771_v49 = vmul.f32 1.442695, %v768_v48 }
 0x566   :  { %1191 = vpow2.f32 %v771_v49 }
 0x56f   :  { %v1190_v50 = vpop.eup %1189 }
 0x570   :  { %v773_v51 = vsel %vm348_vm2, %v1190_v50, 0.0 }
 0x571   :  { %774 = vadd.xlane.f32.xlu1 %v773_v51 }
 0x573   :  { %v1192_v52 = vpop.eup %1191 }
 0x574   :  { %v776_v53 = vsel %vm348_vm2, %v1192_v52, 0.0 }
 0x575   :  { %777 = vadd.xlane.f32.xlu0 %v776_v53 }
 0x5fa   :  { %v775_v54 = vpop.xlane.xlu1 %774 }
 0x5fb   :  { %1193 = vrcp.f32 %v775_v54 }
 0x5fe   :  { %v778_v55 = vpop.xlane.xlu0 %777 }
 0x5ff   :  { %1195 = vrcp.f32 %v778_v55 }
 0x608   :  { %v1194_v56 = vpop.eup %1193 }
 0x609   :  { %v781_v57 = vmul.f32 %v1194_v56, %v1190_v50 }
 0x60b   :  { %v783_v58 = vmul.f32 %v781_v57, %v781_v57 }
 0x60c   :  { %v1196_v59 = vpop.eup %1195 }
 0x60d   :  { %v785_v60 = vsel %vm348_vm2, %v783_v58, 0.0  ;;  %v782_v61 = vmul.f32 %v1196_v59, %v1192_v52 }
 0x60e   :  { %786 = vadd.xlane.f32.xlu1 %v785_v60 }
 0x60f   :  { %v784_v62 = vmul.f32 %v782_v61, %v782_v61 }
 0x611   :  { %v788_v63 = vsel %vm348_vm2, %v784_v62, 0.0 }
 0x612   :  { %789 = vadd.xlane.f32.xlu1 %v788_v63 }
 0x697   :  { %v787_v0 = vpop.xlane.xlu1 %786 }
 0x698   :  { %1197 = vrsqrt.f32 %v787_v0 }
 0x69b   :  { %v790_v1 = vpop.xlane.xlu1 %789 }
 0x69c   :  { %1199 = vrsqrt.f32 %v790_v1 }
 0x6a5   :  { %v1198_v2 = vpop.eup %1197 }
 0x6a6   :  { %v793_v3 = vmul.f32 %v1198_v2, %v781_v57 }
 0x6a8   :  { %1172 = vmatpush3.xpose.msk.msra.mxu0 %vm348_vm2, %v793_v3 }
 0x6a9   :  { %v1200_v4 = vpop.eup %1199 }
 0x6aa   :  { %v794_v5 = vmul.f32 %v1200_v4, %v782_v61 }
 0x6ab   :  { %1174 = vmatmul.mubr.msk.f32.vlgmr.msra.gmra.mxu0 %vm348_vm2, %v793_v3 }
 0x6ac   :  { %1177 = vmatpush3.xpose.msk.msra.mxu1 %vm348_vm2, %v794_v5 }
 0x6af   :  { %1179 = vmatmul.mubr.msk.f32.vlgmr.msra.gmra.mxu1 %vm348_vm2, %v794_v5 }
 0x6b0   :  { %1212 = shalt.err (!%p1209_p4)
}
 0x6b1   :  { %967 = dma.vmem_to_hbm [thread:$0]  %s965_s27, 128, %s1577_s8, [#allocation5]  }
 0x6b2   :  { %s1221_s12 = scalar_lea.vmem %s955_s1, 128  ;;  %p1226_p6 = scmp.lt.s32.totalorder %s955_s1, %s955_s1 }
 0x6b3   :  { %p1222_p5 = scmp.ne.s32.totalorder %s955_s1, %s1221_s12  ;;  %p1227_p7 = scmp.lt.s32.totalorder %s1221_s12, %s1221_s12 }
 0x6b5   :  { %p1228_p8 = por %p1227_p7, %p1226_p6 }
 0x6b7   :  { %p1229_p9 = pnand %p1228_p8, %p1222_p5 }
 0x6b9   :  { %1232 = shalt.err (!%p1229_p9)
}
 0x6ba   :  { %957 = dma.vmem_to_hbm [thread:$0]  %s955_s1, 128, %s1576_s7, [#allocation3]  }
 0x6bb   :  { %s1291_s15 = smov [#allocation6]   ;;  %s1292_s17 = smov [#allocation7]  }
 0x6bc   :  { %s974_s16 = sshll.u32 %s1291_s15, 4  ;;  %s984_s18 = sshll.u32 %s1292_s17, 4  ;;  %s975_s16 = int_to_ptr.vmem [resolvable:$true] %s974_s16  ;;  %s985_s18 = int_to_ptr.vmem [resolvable:$true] %s984_s18 }
 0x6bd   :  { %s1241_s8 = scalar_lea.vmem %s975_s16, 128  ;;  %p1246_p11 = scmp.lt.s32.totalorder %s975_s16, %s975_s16 }
 0x6be   :  { %p1242_p10 = scmp.ne.s32.totalorder %s975_s16, %s1241_s8  ;;  %p1247_p12 = scmp.lt.s32.totalorder %s1241_s8, %s1241_s8 }
 0x6c0   :  { %p1248_p13 = por %p1247_p12, %p1246_p11 }
 0x6c2   :  { %p1249_p0 = pnand %p1248_p13, %p1242_p10 }
 0x76b   :  { %v864_v6 = vpop.f32.mrf.mxu0 }
 0x76c   :  { %944 = vst.msk [vmem:[#allocation6] sm:$0xff] %vm391_vm6, %v864_v6 }
 0x76d   :  { %v1175_v7 = vpop.f32.mrf.mxu0 }
 0x76e   :  { %1252 = shalt.err (!%p1249_p0)
}
 0x76f   :  { %977 = dma.vmem_to_hbm [thread:$0]  %s975_s16, 128, %s1578_s9, [#allocation5]   ;;  %v937_v8 = vpop.f32.mrf.mxu1 }
 0x770   :  { %945 = vst.msk [vmem:[#allocation7] sm:$0xff] %vm391_vm6, %v937_v8  ;;  %s1261_s7 = scalar_lea.vmem %s985_s18, 128  ;;  %p1266_p2 = scmp.lt.s32.totalorder %s985_s18, %s985_s18 }
 0x771   :  { %v1180_v9 = vpop.f32.mrf.mxu1  ;;  %p1262_p1 = scmp.ne.s32.totalorder %s985_s18, %s1261_s7  ;;  %p1267_p3 = scmp.lt.s32.totalorder %s1261_s7, %s1261_s7 }
 0x773   :  { %p1268_p4 = por %p1267_p3, %p1266_p2 }
 0x775   :  { %p1269_p5 = pnand %p1268_p4, %p1262_p1 }
 0x777   :  { %1272 = shalt.err (!%p1269_p5)
}
 0x778   :  { %987 = dma.vmem_to_hbm [thread:$0]  %s985_s18, 128, %s1579_s10, [#allocation8]  }
 0x779   :  { %1281 = dma.done.wait [#allocation3], 128  }
 0x77a   :  { %1282 = vsyncadd [#allocation3], 4294967168 }
 0x77b   :  { %1283 = dma.done.wait [#allocation5], 256  }
 0x77c   :  { %1284 = vsyncadd [#allocation5], 4294967040 }
 0x77d   :  { %1285 = dma.done.wait [#allocation8], 128  }
 0x77e   :  { %1286 = vsyncadd [#allocation8], 4294967168 }
 0x77f   :  { %1002 = vsyncpa [#allocation3], 1 }
 0x780   :  { %1003 = vsyncpa [#allocation5], 1 }
 0x781   :  { %1004 = vsyncpa [#allocation8], 1 }

</bundles_post_ra>
